<compile_context>
chip_gen: v7x
topology: tpu7x:2x2x1
jax: 0.10.0
libtpu: 0.0.40
codegen_flags: <defaults>
</compile_context>

<pallas_src>
import jax
import jax.numpy as jnp
from jax.experimental import pallas as pl
from jax.experimental.pallas import tpu as pltpu


def _drop_path_kernel(mask_ref, x_ref, o_ref):
    # mask_ref: SMEM (B,) float32 scalar-prefetch; one scale per batch element.
    # x_ref / o_ref: VMEM tile of shape (1, TILE_S, L) for batch index b.
    b = pl.program_id(0)
    scale = mask_ref[b].astype(o_ref.dtype)   # scalar SMEM load, cast once
    o_ref[...] = x_ref[...] * scale           # native-dtype VPU multiply


_LANE_CANDIDATES = (4096, 2048, 1024, 512, 256, 128)
_TARGET_BLOCK_BYTES = 2 * 1024 * 1024         # ~2 MiB per block (in + out double-
                                              # buffered ≈ 8 MiB < 16 MiB v5e scoped VMEM)


def _pick_layout(feat, itemsize):
    """Choose lane width L, sublane count S and sublane tile for (B, S, L)."""
    lane = next(c for c in _LANE_CANDIDATES if feat % c == 0)
    sub = feat // lane
    rows = max(1, _TARGET_BLOCK_BYTES // (lane * itemsize))
    if sub <= 8:
        tile_s = sub                          # block == full sublane extent
    else:
        tile_s = min(sub, max(8, (rows // 8) * 8))  # multiple of 8
    return lane, sub, tile_s


def drop_path_pallas(x, keep_prob: float, key, training: bool = True):
    """DropPath forward.  Matches `DropPath(p=keep_prob).forward` semantics."""
    if (not training) or keep_prob <= 0.0:
        return x

    B = x.shape[0]
    orig_shape = x.shape
    orig_dtype = x.dtype

    # Per-sample Bernoulli mask already divided by keep_prob (tiny glue op).
    mask = jax.random.bernoulli(key, p=keep_prob, shape=(B,)).astype(jnp.float32)
    mask = mask / jnp.float32(keep_prob)

    flat = x.reshape(B, -1)
    F = flat.shape[1]
    pad = (-F) % 128
    if pad:
        # TODO(synk): handle the ragged tail with an in-kernel masked store
        # instead of this host-side pad + slice (each is an extra HBM copy).
        flat = jnp.pad(flat, ((0, 0), (0, pad)))
    Fp = flat.shape[1]

    itemsize = jnp.dtype(orig_dtype).itemsize
    L, S, tile_s = _pick_layout(Fp, itemsize)
    x3 = flat.reshape(B, S, L)
    num_tiles = pl.cdiv(S, tile_s)

    out3 = pl.pallas_call(
        _drop_path_kernel,
        out_shape=jax.ShapeDtypeStruct((B, S, L), orig_dtype),
        grid_spec=pltpu.PrefetchScalarGridSpec(
            num_scalar_prefetch=1,            # mask -> SMEM
            grid=(B, num_tiles),
            in_specs=[pl.BlockSpec((1, tile_s, L), lambda b, s, m: (b, s, 0))],
            out_specs=pl.BlockSpec((1, tile_s, L), lambda b, s, m: (b, s, 0)),
        ),
        compiler_params=pltpu.CompilerParams(
            dimension_semantics=("parallel", "parallel")),
    )(mask, x3)

    out = out3.reshape(B, Fp)
    if pad:
        out = out[:, :F]
    return out.reshape(orig_shape)


class DropPathPallas:
    """Mirror of the PyTorch DropPath module (training flag passed explicitly)."""

    def __init__(self, p: float = 0.5, inplace: bool = False):
        self.p = p
        self.inplace = inplace  # inplace has no meaning for functional JAX arrays

    def __call__(self, x, key, training: bool = True):
        if training and self.p > 0:
            return drop_path_pallas(x, self.p, key, training=True)
        return x


if __name__ == "__main__":
    root = jax.random.PRNGKey(0)
    k_x, k_mask, k_x2 = jax.random.split(root, 3)

    module = DropPathPallas(p=0.5)

    # Case 1: small NCHW input, feature count divisible by 128 (no pad path).
    x = jax.random.normal(k_x, (2, 4, 16, 16), dtype=jnp.float32)
    y = jax.block_until_ready(module(x, k_mask, training=True))
    mask_ref = jax.random.bernoulli(k_mask, p=0.5, shape=(2,)).astype(jnp.float32) / 0.5
    y_ref = x * mask_ref.reshape(2, 1, 1, 1)
    assert y.shape == x.shape and y.dtype == x.dtype
    assert jnp.allclose(y, y_ref, atol=1e-6), "mismatch vs reference (aligned case)"

    # Case 2: ragged feature count (exercises pad fallback path).
    x2 = jax.random.normal(k_x2, (2, 5, 10, 10), dtype=jnp.float32)
    y2 = jax.block_until_ready(module(x2, k_mask, training=True))
    mask_ref2 = jax.random.bernoulli(k_mask, p=0.5, shape=(2,)).astype(jnp.float32) / 0.5
    y2_ref = x2 * mask_ref2.reshape(2, 1, 1, 1)
    assert y2.shape == x2.shape and y2.dtype == x2.dtype
    assert jnp.allclose(y2, y2_ref, atol=1e-6), "mismatch vs reference (ragged case)"

    # Eval-mode forward is identity.
    y_eval = module(x, k_mask, training=False)
    assert jnp.array_equal(y_eval, x)

    print("KERNEL_OK")
</pallas_src>

<mosaic_0001>
module attributes {stable_mosaic.version = 11 : i64} {
  func.func @_drop_path_kernel(%arg0: i32, %arg1: i32, %arg2: memref<2xf32, #tpu.memory_space<smem>>, %arg3: memref<1x1x1024xf32, #tpu.memory_space<vmem>>, %arg4: memref<1x1x1024xf32, #tpu.memory_space<vmem>>) attributes {dimension_semantics = [#tpu.dimension_semantics<parallel>, #tpu.dimension_semantics<parallel>], iteration_bounds = array<i64: 2, 1>, scalar_prefetch = 1 : i64, scratch_operands = 0 : i64, tpu.core_type = #tpu.core_type<tc>, window_params = [{transform_indices = @transform_0, window_bounds = array<i64: 1, 1, 1024>}, {transform_indices = @transform_1, window_bounds = array<i64: 1, 1, 1024>}]} {
    %0 = arith.index_cast %arg0 : i32 to index
    %1 = memref.load %arg2[%0] : memref<2xf32, #tpu.memory_space<smem>>
    %c0 = arith.constant 0 : index
    %c0_0 = arith.constant 0 : index
    %c0_1 = arith.constant 0 : index
    %2 = vector.load %arg3[%c0, %c0_0, %c0_1] : memref<1x1x1024xf32, #tpu.memory_space<vmem>>, vector<1x1x1024xf32>
    %3 = vector.broadcast %1 : f32 to vector<1x1x1024xf32>
    %4 = arith.mulf %2, %3 : vector<1x1x1024xf32>
    %c0_2 = arith.constant 0 : index
    %c0_3 = arith.constant 0 : index
    %c0_4 = arith.constant 0 : index
    %5 = vector.load %arg4[%c0_2, %c0_3, %c0_4] : memref<1x1x1024xf32, #tpu.memory_space<vmem>>, vector<1x1x1024xf32>
    tpu.vector_store %arg4[%c0_2, %c0_3, %c0_4], %4 {strides = array<i32>} : memref<1x1x1024xf32, #tpu.memory_space<vmem>>, vector<1x1x1024xf32>,
    return
  }
  func.func @transform_0(%arg0: i32, %arg1: i32, %arg2: memref<2xf32, #tpu.memory_space<smem>>) -> (i32, i32, i32) {
    %c0_i32 = arith.constant 0 : i32
    %c0_i32_0 = arith.constant 0 : i32
    return %arg0, %arg1, %c0_i32 : i32, i32, i32
  }
  func.func @transform_1(%arg0: i32, %arg1: i32, %arg2: memref<2xf32, #tpu.memory_space<smem>>) -> (i32, i32, i32) {
    %c0_i32 = arith.constant 0 : i32
    %c0_i32_0 = arith.constant 0 : i32
    return %arg0, %arg1, %c0_i32 : i32, i32, i32
  }
}

</mosaic_0001>

<bundles_post_ra>
// kernel: tpu_custom_call.1
= control target key start
LH: loop header
LB: loop body
LE: loop exit
PB: predicated region body
PF: predicated region fallthrough
CT: control target
= control target key end

     0   :  { %s671_s0 = inlined_call_operand.hbm [shape: f32[2], index: 0, kind: input, shape index: {}]   ;;  %s672_s1 = inlined_call_operand.hbm [shape: f32[2,1,1024], index: 1, kind: input, shape index: {}]   ;;  %s673_s2 = inlined_call_operand.hbm [shape: f32[2,1,1024], index: 2, kind: output, shape index: {}]  }
   0x1   :  { %s342_s11 = scalar_lea.hbm %s671_s0, 16 }
   0x2   :  { %p343_p0 = scmp.ne.s32.totalorder %s671_s0, %s342_s11  ;;  %p346_p1 = scmp.lt.u32.totalorder %s342_s11, %s671_s0 }
   0x4   :  { %p348_p2 = pnand %p346_p1, %p343_p0 }
   0x6   :  { %351 = shalt.err (!%p348_p2)  }
   0x7   :  { %s468_s16 = smov [#allocation3]  }
   0x8   :  { %8 = dma.hbm_to_smem %s671_s0, 16, %s468_s16, [#allocation2] }
   0x9   :  { %434 = dma.done.wait [#allocation2], 16 }
   0xa   :  { %435 = vsyncadd [#allocation2], 4294967280 }
   0xb   :  { %10 = sfence }
   0xc   :  { %11 = vsyncpa [#allocation5], 0 }
   0xd   :  { %13 = vsyncpa [#allocation5 + $0x1], 0 }
   0xe   :  { %14 = vsyncpa [#allocation6], 0 }
   0xf   :  { %16 = vsyncpa [#allocation6 + $0x1], 0  ;;  %s498_s19 = smov 0   ;;  %s500_s20 = smov 0  }
  0x10   :  { %s502_s21 = smov 0   ;;  %s504_s22 = smov 0  }
  0x11   :  { %s506_s23 = smov 0   ;;  %s508_s24 = smov 0  }
  0x12 LB: > { %s262_s0 = sadd.s32 4294967295, %s466_s24   ;;  %s263_s25 = sadd.s32 4294967294, %s466_s24   ;;  %s466_s24 = sphi %s508_s24, %s22_s24   ;;  %s462_s23 = sphi %s506_s23, %s689_s23   ;;  %s458_s22 = sphi %s504_s22, %s688_s22   ;;  %s454_s21 = sphi %s502_s21, %s687_s21   ;;  %s450_s20 = sphi %s500_s20, %s686_s20   ;;  %s446_s19 = sphi %s498_s19, %s685_s19  }
  0x13   : > { %s34_s26 = sadd.s32 1, %s462_s23  ;;  %s43_s27 = sadd.s32 1, %s454_s21 }
  0x14   : > { %p36_p3 = scmp.ge.s32.totalorder %s34_s26, 2  ;;  %p50_p4 = scmp.ne.s32.totalorder %s454_s21, %s450_s20 }
  0x15   : > { %p51_p5 = scmp.eq.s32.totalorder %s466_s24, 0  ;;  %p56_p6 = scmp.ne.s32.totalorder %s450_s20, %s446_s19 }
  0x16   : > { %s691_s26 = smov (%p36_p3, %s34_s26), 0  ;;  %p57_p8 = scmp.eq.s32.totalorder %s262_s0, 0 }
  0x17   : > { %p539_p7 = por %p51_p5, %p50_p4  ;;  %s38_s29 = ssub.s32 %s462_s23, %s691_s26 }
  0x18   : > { %p82_p9 = scmp.eq.s32.totalorder %s262_s0, 1  ;;  %p41_p10 = scmp.eq.s32.totalorder %s38_s29, 0 }
  0x19   : > { %p545_p11 = por %p57_p8, %p56_p6  ;;  %p88_p13 = scmp.eq.s32.totalorder %s263_s25, 1 }
  0x1a   : > { %p549_p12 = por %p82_p9, %p50_p4  ;;  %p291_p2 = scmp.lt.s32.totalorder %s466_s24, 2 }
  0x1b   : > { %s554_s4 = scalar_select %p41_p10, %s454_s21, %s43_s27  }
  0x1c   : > { %s677_s3 = scalar_select %p549_p12, 1, 0 }
  0x1d   : > { %p556_p0 = por %p88_p13, %p56_p6  ;;  %s108_s6 = sand.u32 1, %s454_s21  }
  0x1e   : > { %s266_s7 = sshll.u32 %s108_s6, 3  ;;  %s277_s8 = sshll.u32 %s462_s23, 7 }
  0x1f   : > { %s678_s5 = scalar_select %p556_p0, 1, 0 }
  0x20   : > { %s567_s11 = scalar_lea.hbm %s672_s1, %s277_s8  ;;  %s112_s12 = scalar_lea.vmem [#allocation4], %s266_s7 }
  0x21   : > { %s122_s13 = sshll.u32 %s112_s12, 4  ;;  %p573_p3 = pnand %p291_p2, %p539_p7  ;;  %s569_s13 = int_to_ptr.vmem [resolvable:$true] %s122_s13 }
  0x22   : > { %s109_s15 = scalar_lea.sflag [#allocation5], %s108_s6  ;;  %s352_s16 = scalar_lea.hbm %s567_s11, 128 }
  0x23   : > { %p353_p6 = scmp.ne.s32.totalorder %s567_s11, %s352_s16  ;;  %p354_p8 = pneg %p573_p3 }
  0x24   : > { %s357_s0 = scalar_lea.hbm %s672_s1, 256  ;;  %p358_p7 = scmp.lt.u32.totalorder %s567_s11, %s672_s1 }
  0x25   : > { %p355_p9 = pnand %p354_p8, %p353_p6  ;;  %p359_p13 = scmp.lt.u32.totalorder %s357_s0, %s352_s16 }
  0x26   : > { %p361_p1 = scmp.lt.u32.totalorder %s352_s16, %s567_s11 }
  0x27   : > { %p356_p10 = pneg %p355_p9  ;;  %p360_p2 = por %p359_p13, %p358_p7 }
  0x29   : > { %p362_p4 = por %p361_p1, %p360_p2 }
  0x2b   : > { %p363_p5 = pnand %p362_p4, %p356_p10 }
  0x2d   : > { %366 = shalt.err (!%p363_p5)
}
  0x2e   : > { %s367_s28 = scalar_lea.vmem %s569_s13, 128  ;;  %s469_s29 = smov [#allocation4]  }
  0x2f   : > { %p368_p6 = scmp.ne.s32.totalorder %s569_s13, %s367_s28  ;;  %s372_s6 = sshll.u32 %s469_s29, 4  ;;  %s373_s6 = int_to_ptr.vmem [resolvable:$false] %s372_s6 }
  0x30   : > { %s374_s7 = scalar_lea.vmem %s373_s6, 256  ;;  %p375_p12 = scmp.lt.s32.totalorder %s569_s13, %s373_s6 }
  0x31   : > { %p370_p9 = pnand %p368_p6, %p354_p8  ;;  %p376_p7 = scmp.lt.s32.totalorder %s374_s7, %s367_s28 }
  0x33   : > { %p371_p0 = pneg %p370_p9  ;;  %p377_p13 = por %p376_p7, %p375_p12 }
  0x35   : > { %p378_p1 = pnand %p377_p13, %p371_p0 }
  0x37   : > { %381 = shalt.err (!%p378_p1)
}
  0x38   : > { %286 = dma.hbm_to_vmem [thread:$0]  (!%p573_p3), %s567_s11, 128, %s569_s13, %s109_s15  }
  0x39   : > { %p680_p4 = scmp.lt.s32.totalorder %s466_s24, 3  ;;  %p681_p5 = scmp.ge.s32.totalorder %s466_s24, 1 }
  0x3b   : > { %p128_p8 = pnand %p681_p5, %p680_p4 }
  0x3c   : > { %s609_s8 = sand.u32 (!%p128_p8), 1, %s450_s20  }
  0x3d   : > { %131 = sbr.rel (%p128_p8) target bundleno = 95 (0x5f), region = 24  ;;  %s270_s9 = sshll.u32 (!%p128_p8), %s609_s8, 3 }
  0x3e   : > { %s134_s10 = scalar_lea.sflag (!%p128_p8), [#allocation5], %s609_s8  ;;  %s137_s12 = scalar_lea.vmem (!%p128_p8), [#allocation4], %s270_s9 }
  0x44   : > { %437 = dma.done.wait (%p545_p11), %s134_s10, 128  }
  0x45   : > { %439 = vsyncadd (%p545_p11), %s134_s10, 4294967168  ;;  %s156_s11 = sld [smem:[#allocation3 + %s458_s22]]  ;;  %s155_s13 = scalar_lea.vmem [#allocation7], %s270_s9  ;;  %v157_v0 = vld [vmem:[%s137_s12] sm:$0xff] }
  0x46   : > { %s178_s14 = sshll.u32 %s155_s13, 4  ;;  %s278_s15 = sshll.u32 %s458_s22, 7  ;;  %s619_s14 = int_to_ptr.vmem [resolvable:$true] %s178_s14 }
  0x47   : > { %s624_s30 = scalar_lea.hbm %s673_s2, %s278_s15  ;;  %s162_s18 = scalar_lea.sflag [#allocation6], %s609_s8 }
  0x48   : > { %s382_s0 = scalar_lea.vmem %s619_s14, 128  ;;  %p682_p12 = scmp.ne.s32.totalorder %s677_s3, 0 }
  0x49   : > { %p383_p11 = scmp.ne.s32.totalorder %s619_s14, %s382_s0  ;;  %s470_s22 = smov [#allocation7]  }
  0x4a   : > { %s386_s25 = sshll.u32 %s470_s22, 4  ;;  %s387_s25 = int_to_ptr.vmem [resolvable:$false] %s386_s25 }
  0x4b   : > { %v158_v1 = vstv %s156_s11  ;;  %p384_p0 = pnand %p383_p11, %p682_p12  ;;  %s388_s27 = scalar_lea.vmem %s387_s25, 256 }
  0x4c   : > { %v159_v2 = vmul.f32 %v158_v1, %v157_v0  ;;  %p389_p10 = scmp.lt.s32.totalorder %s619_s14, %s387_s25  ;;  %p390_p2 = scmp.lt.s32.totalorder %s388_s27, %s382_s0 }
  0x4d   : > { %p385_p3 = pneg %p384_p0 }
  0x4e   : > { %160 = vst [vmem:[%s155_s13] sm:$0xff] %v159_v2  ;;  %p391_p6 = por %p390_p2, %p389_p10 }
  0x50   : > { %p392_p9 = pnand %p391_p6, %p385_p3 }
  0x52   : > { %395 = shalt.err (!%p392_p9)
}
  0x53   : > { %s396_s28 = scalar_lea.hbm %s624_s30, 128  ;;  %s400_s7 = scalar_lea.hbm %s673_s2, 256 }
  0x54   : > { %p397_p7 = scmp.ne.s32.totalorder %s624_s30, %s396_s28  ;;  %p401_p4 = scmp.lt.u32.totalorder %s624_s30, %s673_s2 }
  0x55   : > { %p402_p5 = scmp.lt.u32.totalorder %s400_s7, %s396_s28  ;;  %p404_p11 = scmp.lt.u32.totalorder %s396_s28, %s624_s30 }
  0x56   : > { %p398_p13 = pnand %p397_p7, %p682_p12 }
  0x57   : > { %p403_p8 = por %p402_p5, %p401_p4 }
  0x58   : > { %p399_p1 = pneg %p398_p13 }
  0x59   : > { %p405_p0 = por %p404_p11, %p403_p8 }
  0x5b   : > { %p406_p3 = pnand %p405_p0, %p399_p1 }
  0x5d   : > { %409 = shalt.err (!%p406_p3)
}
  0x5e   : > { %281 = dma.vmem_to_hbm [thread:$0]  (%p682_p12), %s619_s14, 128, %s624_s30, %s162_s18  }
  0x5f PF: > { %s190_s10 = sand.u32 1, %s446_s19   ;;  %p683_p10 = scmp.ne.s32.totalorder %s678_s5, 0 }
  0x60   : > { %p684_p2 = scmp.ge.s32.totalorder %s466_s24, 2  ;;  %s191_s12 = scalar_lea.sflag [#allocation6], %s190_s10 }
  0x62   : > { %p288_p6 = pnand %p684_p2, %p683_p10 }
  0x64   : > { %441 = dma.done.wait (!%p288_p6), %s191_s12, 128  }
  0x65   : > { %443 = vsyncadd (!%p288_p6), %s191_s12, 4294967168  ;;  %s22_s24 = sadd.s32 1, %s466_s24   ;;  %s685_s19 = smov %s450_s20 }
  0x66   : > { %p19_p9 = scmp.ge.s32.totalorder %s22_s24, 4   ;;  %s686_s20 = smov %s454_s21 }
  0x67   : > { %s687_s21 = smov %s554_s4  ;;  %s688_s22 = smov %s462_s23 }
  0x68   : > { %s689_s23 = smov %s691_s26  ;;  %21 = sbr.rel (!%p19_p9) target bundleno = 18 (0x12), region = 69 }
  0x6f   :  { %196 = vsyncpa [#allocation5], 1 }
  0x70   :  { %198 = vsyncpa [#allocation5 + $0x1], 1 }
  0x71   :  { %199 = vsyncpa [#allocation6], 1 }
  0x72   :  { %201 = vsyncpa [#allocation6 + $0x1], 1 }

</bundles_post_ra>
